<compile_context>
chip_gen: v7x
topology: tpu7x:2x2x1
jax: 0.10.0
libtpu: 0.0.40
codegen_flags: <defaults>
</compile_context>

<pallas_src>
import functools

import jax
import jax.numpy as jnp
from jax.experimental import pallas as pl
from jax.experimental.pallas import tpu as pltpu


def _round_up(a, b):
    return -(-a // b) * b


def _td_linear_kernel(x_ref, w_ref, b_ref, o_ref):
    # x_ref: (tm, F_in)  w_ref: (F_in, F_out)  b_ref: (1, F_out) f32  o_ref: (tm, F_out)
    acc = jnp.dot(x_ref[...], w_ref[...], preferred_element_type=jnp.float32)
    o_ref[...] = (acc + b_ref[...]).astype(o_ref.dtype)


def _td_linear_bn_kernel(x_ref, w_ref, b_ref, s_ref, t_ref, o_ref):
    # Same as above plus fused eval-mode BatchNorm: per-channel scale + shift.
    acc = jnp.dot(x_ref[...], w_ref[...], preferred_element_type=jnp.float32)
    acc = (acc + b_ref[...]) * s_ref[...] + t_ref[...]
    o_ref[...] = acc.astype(o_ref.dtype)


def _td_linear_rows(x2d, weight, bias, bn_scale=None, bn_shift=None, *, block_rows=512):
    """Row-flattened core: x2d (rows, F_in) -> (rows, F_out)."""
    rows, F_in = x2d.shape
    F_out, F_in_w = weight.shape
    assert F_in_w == F_in, (F_in_w, F_in)

    # --- row tile: multiple of 8 sublanes (16 for bf16), >= 2 grid steps ----
    sub = 16 if jnp.dtype(x2d.dtype) == jnp.bfloat16 else 8
    tm = max(sub, (min(block_rows, rows) // sub) * sub)
    tm = max(sub, min(tm, _round_up(-(-rows // 2), sub)))  # >=2 steps for v7x megacore
    grid = pl.cdiv(rows, tm)

    wt = jnp.transpose(weight)  # (F_in, F_out): lane-dense matmul output
    b2 = (jnp.zeros((F_out,), jnp.float32) if bias is None
          else bias.astype(jnp.float32)).reshape(1, F_out)

    in_specs = [
        pl.BlockSpec((tm, F_in), lambda i: (i, 0)),
        pl.BlockSpec((F_in, F_out), lambda i: (0, 0)),   # VMEM resident
        pl.BlockSpec((1, F_out), lambda i: (0, 0)),      # VMEM resident
    ]
    args = [x2d, wt, b2]
    kernel = _td_linear_kernel

    if bn_scale is not None:
        s2 = bn_scale.astype(jnp.float32).reshape(1, F_out)
        t2 = (jnp.zeros((F_out,), jnp.float32) if bn_shift is None
              else bn_shift.astype(jnp.float32)).reshape(1, F_out)
        in_specs += [pl.BlockSpec((1, F_out), lambda i: (0, 0)),
                     pl.BlockSpec((1, F_out), lambda i: (0, 0))]
        args += [s2, t2]
        kernel = _td_linear_bn_kernel

    # --- VMEM budget: double-buffered x/out tiles + resident weight ---------
    itemsize = jnp.dtype(x2d.dtype).itemsize
    lane_in, lane_out = _round_up(F_in, 128), _round_up(F_out, 128)
    vmem_est = (2 * tm * lane_in * itemsize          # x tiles (double-buffered)
                + 2 * tm * lane_out * itemsize       # out tiles (double-buffered)
                + 2 * _round_up(F_in, 8) * lane_out * jnp.dtype(weight.dtype).itemsize
                + 8 * 8 * lane_out * 4)              # bias / scale / shift
    vmem_limit = int(min(max(2 * vmem_est, 32 << 20), 64 << 20))

    cost = pl.CostEstimate(
        flops=2 * rows * F_in * F_out,
        transcendentals=0,
        bytes_accessed=(rows * F_in + rows * F_out + F_in * F_out) * itemsize,
    )

    return pl.pallas_call(
        kernel,
        out_shape=jax.ShapeDtypeStruct((rows, F_out), x2d.dtype),
        grid_spec=pltpu.PrefetchScalarGridSpec(
            num_scalar_prefetch=0,
            grid=(grid,),
            in_specs=in_specs,
            out_specs=pl.BlockSpec((tm, F_out), lambda i: (i, 0)),
        ),
        compiler_params=pltpu.CompilerParams(
            dimension_semantics=("parallel",),
            vmem_limit_bytes=vmem_limit,
        ),
        cost_estimate=cost,
    )(*args)


def td_linear_time_major(x_tnf, weight, bias=None, bn_scale=None, bn_shift=None,
                         *, block_rows=512):
    """Preferred layout: x (T, N, F_in) -> (T, N, F_out), zero relayout."""
    T, N, F_in = x_tnf.shape
    out = _td_linear_rows(x_tnf.reshape(T * N, F_in), weight, bias,
                          bn_scale, bn_shift, block_rows=block_rows)
    return out.reshape(T, N, -1)


def td_linear(x, weight, bias=None, bn_scale=None, bn_shift=None, *,
              block_rows=512, force_pallas=False):
    """tdLayer(nn.Linear(F_in, F_out)) forward in the PyTorch layout.

    Args:
      x:        (N, F_in, T)  -- time on the last axis (PyTorch tdLayer contract).
      weight:   (F_out, F_in) -- nn.Linear weight.
      bias:     (F_out,) or None.
      bn_scale: optional (F_out,) eval-mode tdBatchNorm per-channel scale.
      bn_shift: optional (F_out,) eval-mode tdBatchNorm per-channel shift.
    Returns:
      (N, F_out, T)
    """
    N, F_in, T = x.shape
    F_out = weight.shape[0]
    rows = N * T

    # Tiny problems: the pallas_call launch + relayout transposes dominate;
    # let XLA's fused einsum handle it.
    small = rows * F_out * jnp.dtype(x.dtype).itemsize < (1 << 20)
    if small and not force_pallas:
        out = jnp.einsum("nit,oi->not", x, weight,
                         preferred_element_type=jnp.float32)
        if bias is not None:
            out = out + bias[None, :, None]
        if bn_scale is not None:
            out = out * bn_scale[None, :, None]
            if bn_shift is not None:
                out = out + bn_shift[None, :, None]
        return out.astype(x.dtype)

    # PyTorch layout plumbing (a pure relayout, not compute).  If the
    # surrounding SNN can keep activations time-major, call
    # td_linear_time_major() directly and skip both transposes.
    xt = jnp.transpose(x, (2, 0, 1))
    out = td_linear_time_major(xt, weight, bias, bn_scale, bn_shift,
                               block_rows=block_rows)
    return jnp.transpose(out, (1, 2, 0))
    # TODO(synk): training-mode tdBatchNorm (batch statistics) and wrapping
    # non-Linear layers (e.g. Conv2d) are not implemented in this kernel; only
    # the per-timestep Linear + eval-mode per-channel scale/shift is fused.


if __name__ == "__main__":
    key = jax.random.PRNGKey(0)
    k_x, k_w, k_b, k_g, k_x2 = jax.random.split(key, 5)

    # batch=16, in_features=32, out_features=128, time_window=8
    N, F_in, F_out, T = 16, 32, 128, 8
    x = jax.random.normal(k_x, (N, F_in, T), dtype=jnp.float32)
    weight = jax.random.normal(k_w, (F_out, F_in), dtype=jnp.float32) / jnp.sqrt(
        jnp.float32(F_in))
    bias = jax.random.normal(k_b, (F_out,), dtype=jnp.float32) * 0.1

    # Reference: the tdLayer loop `out[..., t] = layer(x[..., t])`.
    ref = (jnp.einsum("nit,oi->not", x, weight, preferred_element_type=jnp.float32)
           + bias[None, :, None])

    # --- Pallas path (forced, so the kernel is exercised at demo scale) -----
    fn = jax.jit(functools.partial(td_linear, force_pallas=True))
    out = jax.block_until_ready(fn(x, weight, bias))
    assert out.shape == (N, F_out, T), out.shape
    if not jnp.allclose(out, ref, atol=5e-2, rtol=5e-2):
        raise AssertionError(f"linear mismatch, max err={jnp.max(jnp.abs(out - ref))}")

    # --- Ragged rows (masked partial block) + fused eval-mode BN ------------
    N2, T2 = 13, 7   # rows = 91, not a multiple of the tile
    x2 = jax.random.normal(k_x2, (N2, F_in, T2), dtype=jnp.float32)
    gamma = 1.0 + 0.1 * jax.random.normal(k_g, (F_out,), dtype=jnp.float32)
    beta = 0.05 * jnp.arange(F_out, dtype=jnp.float32)
    fn2 = jax.jit(functools.partial(td_linear, force_pallas=True))
    out2 = jax.block_until_ready(fn2(x2, weight, bias, gamma, beta))
    ref2 = ((jnp.einsum("nit,oi->not", x2, weight, preferred_element_type=jnp.float32)
             + bias[None, :, None]) * gamma[None, :, None] + beta[None, :, None])
    assert out2.shape == (N2, F_out, T2), out2.shape
    if not jnp.allclose(out2, ref2, atol=5e-2, rtol=5e-2):
        raise AssertionError(f"bn mismatch, max err={jnp.max(jnp.abs(out2 - ref2))}")

    # --- Auto path (small-problem einsum fallback) must agree ---------------
    out3 = jax.block_until_ready(jax.jit(td_linear)(x, weight, bias))
    if not jnp.allclose(out3, ref, atol=5e-2, rtol=5e-2):
        raise AssertionError("fallback path mismatch")

    print("KERNEL_OK")
</pallas_src>

<mosaic_0001>
module attributes {stable_mosaic.version = 11 : i64} {
  func.func @_td_linear_kernel(%arg0: i32, %arg1: memref<64x32xf32, #tpu.memory_space<vmem>>, %arg2: memref<32x128xf32, #tpu.memory_space<vmem>>, %arg3: memref<1x128xf32, #tpu.memory_space<vmem>>, %arg4: memref<64x128xf32, #tpu.memory_space<vmem>>) attributes {dimension_semantics = [#tpu.dimension_semantics<parallel>], iteration_bounds = array<i64: 2>, scalar_prefetch = 0 : i64, scratch_operands = 0 : i64, tpu.core_type = #tpu.core_type<tc>, window_params = [{transform_indices = @transform_0, window_bounds = array<i64: 64, 32>}, {pipeline_mode = #tpu.pipeline_mode<synchronous>, transform_indices = @transform_1, window_bounds = array<i64: 32, 128>}, {pipeline_mode = #tpu.pipeline_mode<synchronous>, transform_indices = @transform_2, window_bounds = array<i64: 1, 128>}, {transform_indices = @transform_3, window_bounds = array<i64: 64, 128>}]} {
    %c0 = arith.constant 0 : index
    %c0_0 = arith.constant 0 : index
    %0 = vector.load %arg1[%c0, %c0_0] : memref<64x32xf32, #tpu.memory_space<vmem>>, vector<64x32xf32>
    %c0_1 = arith.constant 0 : index
    %c0_2 = arith.constant 0 : index
    %1 = vector.load %arg2[%c0_1, %c0_2] : memref<32x128xf32, #tpu.memory_space<vmem>>, vector<32x128xf32>
    %cst = arith.constant dense<0.000000e+00> : vector<64x128xf32>
    %2 = tpu.matmul %0, %1, %cst {dimension_numbers = #tpu.dot_dimension_numbers<[1], [0], [0], [1], [0, 0, 1, 1], [], []>} : vector<64x32xf32>, vector<32x128xf32>, vector<64x128xf32> -> vector<64x128xf32>
    %c0_3 = arith.constant 0 : index
    %c0_4 = arith.constant 0 : index
    %3 = vector.load %arg3[%c0_3, %c0_4] : memref<1x128xf32, #tpu.memory_space<vmem>>, vector<1x128xf32>
    %4 = vector.broadcast %3 : vector<1x128xf32> to vector<64x128xf32>
    %5 = arith.addf %2, %4 : vector<64x128xf32>
    %c0_5 = arith.constant 0 : index
    %c0_6 = arith.constant 0 : index
    %6 = vector.load %arg4[%c0_5, %c0_6] : memref<64x128xf32, #tpu.memory_space<vmem>>, vector<64x128xf32>
    tpu.vector_store %arg4[%c0_5, %c0_6], %5 {strides = array<i32>} : memref<64x128xf32, #tpu.memory_space<vmem>>, vector<64x128xf32>,
    return
  }
  func.func @transform_0(%arg0: i32) -> (i32, i32) {
    %c0_i32 = arith.constant 0 : i32
    %c0_i32_0 = arith.constant 0 : i32
    return %arg0, %c0_i32 : i32, i32
  }
  func.func @transform_1(%arg0: i32) -> (i32, i32) {
    %c0_i32 = arith.constant 0 : i32
    %c0_i32_0 = arith.constant 0 : i32
    %c0_i32_1 = arith.constant 0 : i32
    return %c0_i32, %c0_i32_0 : i32, i32
  }
  func.func @transform_2(%arg0: i32) -> (i32, i32) {
    %c0_i32 = arith.constant 0 : i32
    %c0_i32_0 = arith.constant 0 : i32
    %c0_i32_1 = arith.constant 0 : i32
    return %c0_i32, %c0_i32_0 : i32, i32
  }
  func.func @transform_3(%arg0: i32) -> (i32, i32) {
    %c0_i32 = arith.constant 0 : i32
    %c0_i32_0 = arith.constant 0 : i32
    return %arg0, %c0_i32 : i32, i32
  }
}

</mosaic_0001>

<bundles_post_ra>
// kernel: td_linear.1
= control target key start
LH: loop header
LB: loop body
LE: loop exit
PB: predicated region body
PF: predicated region fallthrough
CT: control target
= control target key end

     0   :  { %s487_s12 = smov 0   ;;  %s527_s0 = inlined_call_operand.vmem [shape: f32[128,32], index: 0, kind: input, shape index: {}]   ;;  %s528_s1 = inlined_call_operand.vmem [shape: f32[32,128], index: 1, kind: input, shape index: {}]   ;;  %s529_s2 = inlined_call_operand.vmem [shape: f32[1,128], index: 2, kind: input, shape index: {}]   ;;  %s530_s3 = inlined_call_operand.vmem [shape: f32[128,128], index: 3, kind: output, shape index: {}]  }
   0x1 LB: > { %s387_s13 = sadd.s32 4294967295, %s465_s12   ;;  %p391_p0 = scmp.ge.s32.totalorder %s465_s12, 1  ;;  %s465_s12 = sphi %s487_s12, %s13_s12  }
   0x2   : > { %p138_p1 = scmp.lt.s32.totalorder %s465_s12, 3 }
   0x4   : > { %p139_p2 = pnand %p391_p0, %p138_p1 }
   0x5   : > { %v182_v0 = vld [vmem:[%s528_s1] sm:$0xff] (!%p139_p2)  ;;  %v183_v1 = vld [vmem:[%s528_s1 + $0x8] sm:$0xff] (!%p139_p2)  ;;  %v184_v2 = vld [vmem:[%s528_s1 + $0x10] sm:$0xff] (!%p139_p2)  ;;  %s392_s20 = sshll.u32 (!%p139_p2), %s387_s13, 3  ;;  %vm193_vm0 = vcmask (!%p139_p2), 261120  }
   0x6   : > { %142 = sbr.rel (%p139_p2) target bundleno = 239 (0xef), region = 32  ;;  %v439_v3 = vpack.c.bf16 (!%p139_p2), %v183_v1, %v182_v0  ;;  %v185_v4 = vld [vmem:[%s528_s1 + $0x18] sm:$0xff] (!%p139_p2)  ;;  %p163_p3 = scmp.lt.s32.totalorder (!%p139_p2), %s392_s20, 15  ;;  %v396_v14 = vld [vmem:[%s529_s2] ss:$0 sm:$0xff] (!%p139_p2) }
   0x7   : > { %v443_v5 = vpack.c.bf16 (!%p139_p2), %v185_v4, %v184_v2 }
   0x8   : > { %440 = vmatprep.subr.bf16.mxu0 (!%p139_p2), %v439_v3  ;;  %447 = vmatprep.subr.bf16.mxu1 (!%p139_p2), %v439_v3 }
   0x9   : > { %442 = vmatpush3.bf16.msra.mxu0 (!%p139_p2), %v439_v3  ;;  %449 = vmatpush3.bf16.msra.mxu1 (!%p139_p2), %v439_v3 }
   0xa   : > { %444 = vmatprep.subr.bf16.mxu0 (!%p139_p2), %v443_v5  ;;  %448 = vmatprep.subr.bf16.mxu1 (!%p139_p2), %v443_v5 }
   0xd   : > { %s532_s20 = smov (!%p163_p3, %s392_s20), 15  ;;  %446 = vmatpush3.bf16.msra.mxu0 %v443_v5  ;;  %450 = vmatpush3.bf16.msra.mxu1 %v443_v5 }
   0xe   : > { %s393_s23 = sshll.u32 %s532_s20, 3 }
   0xf   : > { %s166_s26 = scalar_lea.vmem %s527_s0, %s393_s23  ;;  %s172_s4 = scalar_lea.vmem %s530_s3, %s393_s23 }
  0x10   : > { %v174_v6 = vld [vmem:[%s166_s26] sm:$0xff]  ;;  %v175_v8 = vld [vmem:[%s166_s26 + $0x8] sm:$0xff]  ;;  %v176_v10 = vld [vmem:[%s166_s26 + $0x10] sm:$0xff] }
  0x11   : > { %v178_v7 = vld [vmem:[%s166_s26 + $0x20] sm:$0xff]  ;;  %v179_v9 = vld [vmem:[%s166_s26 + $0x28] sm:$0xff]  ;;  %427 = vmatprep.mubr.msk.f32.mxu0 %vm193_vm0, %v174_v6  ;;  %v180_v11 = vld [vmem:[%s166_s26 + $0x30] sm:$0xff] }
  0x12   : > { %433 = vmatprep.mubr.msk.f32.mxu1 %vm193_vm0, %v178_v7  ;;  %428 = vmatmul.mubr.msk.f32.vlgmr.msra.gmra.mrb[0].mxu0 %vm193_vm0, %v175_v8  ;;  %v177_v12 = vld [vmem:[%s166_s26 + $0x18] sm:$0xff] }
  0x13   : > { %434 = vmatmul.mubr.msk.f32.vlgmr.msra.gmra.mrb[0].mxu1 %vm193_vm0, %v179_v9  ;;  %430 = vmatprep.mubr.msk.f32.mxu0 %vm193_vm0, %v176_v10  ;;  %v181_v13 = vld [vmem:[%s166_s26 + $0x38] sm:$0xff] }
  0x14   : > { %436 = vmatprep.mubr.msk.f32.mxu1 %vm193_vm0, %v180_v11 }
  0x16   : > { %431 = vmatmul.mubr.msk.f32.gmra.mrb[2].mxu0 %vm193_vm0, %v177_v12 }
  0x17   : > { %437 = vmatmul.mubr.msk.f32.gmra.mrb[2].mxu1 %vm193_vm0, %v181_v13 }
  0xe5   : > { %v429_v15 = vpop.f32.mrb[0].mxu0 }
  0xe6   : > { %v435_v16 = vpop.f32.mrb[0].mxu1  ;;  %v290_v17 = vadd.f32 %v429_v15, %v396_v14  ;;  %v284_v19 = vpop.f32.mrb[1].mxu0 }
  0xe7   : > { %v310_v18 = vadd.f32 %v435_v16, %v396_v14  ;;  %v304_v20 = vpop.f32.mrb[1].mxu1  ;;  %v285_v21 = vadd.f32 %v396_v14, %v284_v19 }
  0xe8   : > { %v305_v22 = vadd.f32 %v396_v14, %v304_v20  ;;  %324 = vst [vmem:[%s172_s4 + $0x8] sm:$0xff] %v290_v17 }
  0xe9   : > { %328 = vst [vmem:[%s172_s4 + $0x28] sm:$0xff] %v310_v18  ;;  %323 = vst [vmem:[%s172_s4] sm:$0xff] %v285_v21  ;;  %v432_v23 = vpop.f32.mrb[2].mxu0 }
  0xea   : > { %327 = vst [vmem:[%s172_s4 + $0x20] sm:$0xff] %v305_v22  ;;  %v438_v24 = vpop.f32.mrb[2].mxu1  ;;  %v300_v25 = vadd.f32 %v432_v23, %v396_v14  ;;  %v294_v27 = vpop.f32.mrb[3].mxu0 }
  0xeb   : > { %v320_v26 = vadd.f32 %v438_v24, %v396_v14  ;;  %v314_v28 = vpop.f32.mrb[3].mxu1  ;;  %v295_v29 = vadd.f32 %v396_v14, %v294_v27 }
  0xec   : > { %v315_v30 = vadd.f32 %v396_v14, %v314_v28  ;;  %326 = vst [vmem:[%s172_s4 + $0x18] sm:$0xff] %v300_v25 }
  0xed   : > { %330 = vst [vmem:[%s172_s4 + $0x38] sm:$0xff] %v320_v26  ;;  %325 = vst [vmem:[%s172_s4 + $0x10] sm:$0xff] %v295_v29 }
  0xee   : > { %329 = vst [vmem:[%s172_s4 + $0x30] sm:$0xff] %v315_v30 }
  0xef PF: > { %s13_s12 = sadd.s32 1, %s465_s12  }
  0xf0   : > { %p10_p4 = scmp.ge.s32.totalorder %s13_s12, 4  }
  0xf2   :  { %12 = sbr.rel (!%p10_p4) target bundleno = 1 (0x1), region = 62 }

</bundles_post_ra>
